<compile_context>
chip_gen: v6e
topology: v6e:2x2x1
jax: 0.10.0
libtpu: 0.0.40
codegen_flags: <defaults>
</compile_context>

<pallas_src>
import functools

import jax
import jax.numpy as jnp
from jax import lax
from jax.experimental import pallas as pl
from jax.experimental.pallas import tpu as pltpu


def _cdiv(a: int, b: int) -> int:
    return -(-a // b)


def _round_up(x: int, m: int) -> int:
    return _cdiv(x, m) * m


def trilinear_kernel(ctx_ref, qry_ref, dw_ref, out_ref, cd_ref):
    # ctx_ref: (1, TM, Dc_pad)   qry_ref: (1, TN, Dq_pad)
    # dw_ref:  (Dc_pad, Dq_pad)  (whole array, VMEM resident)
    # out_ref: (1, TM, TN)
    # cd_ref:  (TM, Dq_pad) scratch in compute dtype; persists across j axis.
    j = pl.program_id(2)

    @pl.when(j == 0)
    def _():
        # (TM, Dc_pad) @ (Dc_pad, Dq_pad) -> (TM, Dq_pad), f32 accumulation,
        # stored once in compute dtype (no per-step recast).
        cd_ref[...] = jnp.dot(
            ctx_ref[0], dw_ref[...],
            preferred_element_type=jnp.float32).astype(cd_ref.dtype)

    # Contract cd (TM, Dq_pad) with qry (TN, Dq_pad) along dim 1 of both sides
    # (MXU-native A @ B^T form; no materialized transpose of the query tile).
    out = lax.dot_general(
        cd_ref[...], qry_ref[0],
        dimension_numbers=(((1,), (1,)), ((), ())),
        preferred_element_type=jnp.float32)
    out_ref[0] = out.astype(out_ref.dtype)


@functools.partial(
    jax.jit, static_argnames=("tile_m", "tile_n", "compute_dtype", "out_dtype"))
def trilinear_similarity(context, query, context_weights, query_weights,
                         dot_weights, *, tile_m: int = 1024, tile_n: int = 2048,
                         compute_dtype=jnp.bfloat16, out_dtype=jnp.bfloat16):
    """context: (B, Lc, Dc), query: (B, Lq, Dq) -> (B, Lc, Lq) in out_dtype."""
    B, Lc, Dc = context.shape
    Bq, Lq, Dq = query.shape
    assert B == Bq
    assert context_weights.shape == (Dc, 1)
    assert query_weights.shape == (Dq, 1)
    assert dot_weights.shape == (Dc, Dq)

    in_isz = jnp.dtype(compute_dtype).itemsize
    out_isz = jnp.dtype(out_dtype).itemsize

    # Contraction dims padded for the extra "ones" column and (8,128) tiling.
    Dc_pad = _round_up(Dc + 1, 128)
    Dq_pad = _round_up(Dq + 1, 128)

    # ---- Tile sizes from tile COUNTS (bounds padding waste) -----------------
    n_m = max(1, _cdiv(Lc, tile_m))
    # v7x has 2 TensorCores: make sure the "parallel" axes expose >= 2 blocks.
    if B * n_m < 2:
        n_m = min(2, _cdiv(Lc, 8))
    tm = _round_up(_cdiv(Lc, n_m), 8)
    Lc_pad = n_m * tm

    n_n = max(1, _cdiv(Lq, tile_n))
    tn = _round_up(_cdiv(Lq, n_n), 128)

    # VMEM working set: double-buffered ctx/qry/out blocks + resident dw + cd.
    def _vmem_need(tm_, tn_):
        return (2 * tm_ * Dc_pad * in_isz        # ctx block x2 buffers
                + 2 * tn_ * Dq_pad * in_isz      # qry block x2 buffers
                + 2 * tm_ * tn_ * out_isz        # out block x2 buffers
                + Dc_pad * Dq_pad * in_isz       # dw_aug (single, resident)
                + tm_ * Dq_pad * in_isz)         # cd scratch

    VMEM_BUDGET = 48 * 1024 * 1024               # safe inside v7x's 64 MiB
    while _vmem_need(tm, tn) > VMEM_BUDGET and tn > 128:
        n_n += 1
        tn = _round_up(_cdiv(Lq, n_n), 128)
    n_n = _cdiv(Lq, tn)
    Lq_pad = n_n * tn

    vmem_limit = int(1.5 * _vmem_need(tm, tn)) + (2 << 20)
    vmem_limit = min(max(vmem_limit, 8 << 20), 56 << 20)

    # ---- Fold biases into the matmul: single fused concat+pad per tensor ----
    # ctx_aug = [ctx | 1], qry_aug = [qry | 1], dw_aug = [[dw, cw], [qw^T, 0]]
    # => (ctx_aug @ dw_aug) @ qry_aug^T
    #  = ctx@dw@qry^T + (ctx@cw)·1^T + 1·(qry@qw)^T   (full trilinear output)
    ctx_aug = jnp.pad(
        jnp.concatenate(
            [context.astype(compute_dtype),
             jnp.ones((B, Lc, 1), compute_dtype)], axis=-1),
        ((0, 0), (0, Lc_pad - Lc), (0, Dc_pad - (Dc + 1))))

    qry_aug = jnp.pad(
        jnp.concatenate(
            [query.astype(compute_dtype),
             jnp.ones((B, Lq, 1), compute_dtype)], axis=-1),
        ((0, 0), (0, Lq_pad - Lq), (0, Dq_pad - (Dq + 1))))

    dw_top = jnp.concatenate([dot_weights, context_weights], axis=1)      # (Dc, Dq+1)
    dw_bot = jnp.concatenate(
        [query_weights.T, jnp.zeros((1, 1), query_weights.dtype)], axis=1)  # (1, Dq+1)
    dw_aug = jnp.pad(
        jnp.concatenate([dw_top, dw_bot], axis=0).astype(compute_dtype),
        ((0, Dc_pad - (Dc + 1)), (0, Dq_pad - (Dq + 1))))

    grid = (B, n_m, n_n)

    flops = 2 * B * (Lc_pad * Dc_pad * Dq_pad + Lc_pad * Lq_pad * Dq_pad)
    bytes_accessed = (B * Lc_pad * Dc_pad * in_isz                 # ctx, once
                      + B * n_m * Lq_pad * Dq_pad * in_isz         # qry, per Lc tile
                      + Dc_pad * Dq_pad * in_isz                   # dw, once
                      + B * Lc_pad * Lq_pad * out_isz)             # output

    out_padded = pl.pallas_call(
        trilinear_kernel,
        out_shape=jax.ShapeDtypeStruct((B, Lc_pad, Lq_pad), out_dtype),
        grid_spec=pltpu.PrefetchScalarGridSpec(
            num_scalar_prefetch=0,
            grid=grid,
            in_specs=[
                pl.BlockSpec((1, tm, Dc_pad), lambda b, i, j: (b, i, 0)),
                pl.BlockSpec((1, tn, Dq_pad), lambda b, i, j: (b, j, 0)),
                # dw_aug never changes across the grid: keep one copy resident
                # in VMEM instead of a double-buffered pipelined block.
                pl.BlockSpec(memory_space=pltpu.MemorySpace.VMEM),
            ],
            out_specs=pl.BlockSpec((1, tm, tn), lambda b, i, j: (b, i, j)),
            scratch_shapes=[pltpu.VMEM((tm, Dq_pad), compute_dtype)],
        ),
        compiler_params=pltpu.CompilerParams(
            # j (Lq tiles) carries the cd cache -> "arbitrary";
            # B and Lc tiles are independent -> "parallel" (megacore sharding).
            dimension_semantics=("parallel", "parallel", "arbitrary"),
            vmem_limit_bytes=vmem_limit,
        ),
        cost_estimate=pl.CostEstimate(
            flops=flops, transcendentals=0, bytes_accessed=bytes_accessed),
    )(ctx_aug, qry_aug, dw_aug)

    return out_padded[:, :Lc, :Lq]


if __name__ == "__main__":
    # Small shapes: B=2, Lc=16, Lq=8, context_input_dim=Dc=32, query_input_dim=Dq=32
    B, Lc, Lq, Dc, Dq = 2, 16, 8, 32, 32

    key = jax.random.PRNGKey(0)
    k_ctx, k_qry, k_cw, k_qw, k_dw = jax.random.split(key, 5)

    context = jax.random.normal(k_ctx, (B, Lc, Dc), dtype=jnp.float32)
    query = jax.random.normal(k_qry, (B, Lq, Dq), dtype=jnp.float32)
    context_weights = jax.random.normal(k_cw, (Dc, 1), dtype=jnp.float32) * 0.1
    query_weights = jax.random.normal(k_qw, (Dq, 1), dtype=jnp.float32) * 0.1
    dot_weights = jax.random.normal(k_dw, (Dc, Dq), dtype=jnp.float32) * 0.1

    # Pure-JAX reference (matches the PyTorch module with dropout=None).
    ref = (jnp.einsum("bcd,dq,bkq->bck", context, dot_weights, query)
           + jnp.matmul(query, query_weights).transpose(0, 2, 1)
           + jnp.matmul(context, context_weights))

    # 1) f32 MXU operands + f32 output: tight check of the kernel structure.
    out_f32 = trilinear_similarity(context, query, context_weights,
                                   query_weights, dot_weights,
                                   compute_dtype=jnp.float32,
                                   out_dtype=jnp.float32)
    out_f32 = jax.block_until_ready(out_f32)
    assert out_f32.shape == (B, Lc, Lq)
    assert jnp.allclose(out_f32, ref, atol=1e-4, rtol=1e-4)

    # 2) Default fast path: bf16 MXU operands + bf16 output (f32 accumulation).
    out_bf16 = trilinear_similarity(context, query, context_weights,
                                    query_weights, dot_weights)
    out_bf16 = jax.block_until_ready(out_bf16)
    assert out_bf16.shape == (B, Lc, Lq)
    assert out_bf16.dtype == jnp.bfloat16
    assert jnp.allclose(out_bf16.astype(jnp.float32), ref, atol=3e-1, rtol=3e-2)

    print("KERNEL_OK")
</pallas_src>

<mosaic_0001>
module attributes {stable_mosaic.version = 11 : i64} {
  func.func @trilinear_kernel(%arg0: i32, %arg1: i32, %arg2: i32, %arg3: memref<1x16x128xf32, #tpu.memory_space<vmem>>, %arg4: memref<1x128x128xf32, #tpu.memory_space<vmem>>, %arg5: memref<128x128xf32, #tpu.memory_space<vmem>>, %arg6: memref<1x16x128xf32, #tpu.memory_space<vmem>>, %arg7: memref<16x128xf32, #tpu.memory_space<vmem>>) attributes {dimension_semantics = [#tpu.dimension_semantics<parallel>, #tpu.dimension_semantics<parallel>, #tpu.dimension_semantics<arbitrary>], iteration_bounds = array<i64: 2, 1, 1>, scalar_prefetch = 0 : i64, scratch_operands = 1 : i64, tpu.core_type = #tpu.core_type<tc>, window_params = [{transform_indices = @transform_0, window_bounds = array<i64: 1, 16, 128>}, {transform_indices = @transform_1, window_bounds = array<i64: 1, 128, 128>}, {pipeline_mode = #tpu.pipeline_mode<synchronous>, transform_indices = @transform_2, window_bounds = array<i64: 128, 128>}, {transform_indices = @transform_3, window_bounds = array<i64: 1, 16, 128>}]} {
    %c0_i32 = arith.constant 0 : i32
    %0 = arith.cmpi eq, %arg2, %c0_i32 : i32
    %1 = arith.extui %0 : i1 to i32
    %c0_i32_0 = arith.constant 0 : i32
    %2 = arith.cmpi ne, %1, %c0_i32_0 : i32
    scf.if %2 {
      %c0_8 = arith.constant 0 : index
      %c0_9 = arith.constant 0 : index
      %c0_10 = arith.constant 0 : index
      %10 = vector.load %arg3[%c0_8, %c0_9, %c0_10] : memref<1x16x128xf32, #tpu.memory_space<vmem>>, vector<1x16x128xf32>
      %11 = vector.shape_cast %10 : vector<1x16x128xf32> to vector<16x128xf32>
      %c0_11 = arith.constant 0 : index
      %c0_12 = arith.constant 0 : index
      %12 = vector.load %arg5[%c0_11, %c0_12] : memref<128x128xf32, #tpu.memory_space<vmem>>, vector<128x128xf32>
      %cst_13 = arith.constant dense<0.000000e+00> : vector<16x128xf32>
      %13 = tpu.matmul %11, %12, %cst_13 {dimension_numbers = #tpu.dot_dimension_numbers<[1], [0], [0], [1], [0, 0, 1, 1], [], []>} : vector<16x128xf32>, vector<128x128xf32>, vector<16x128xf32> -> vector<16x128xf32>
      %c0_14 = arith.constant 0 : index
      %c0_15 = arith.constant 0 : index
      %14 = vector.load %arg7[%c0_14, %c0_15] : memref<16x128xf32, #tpu.memory_space<vmem>>, vector<16x128xf32>
      tpu.vector_store %arg7[%c0_14, %c0_15], %13 {strides = array<i32>} : memref<16x128xf32, #tpu.memory_space<vmem>>, vector<16x128xf32>,
    } else {
    }
    %c0 = arith.constant 0 : index
    %c0_1 = arith.constant 0 : index
    %3 = vector.load %arg7[%c0, %c0_1] : memref<16x128xf32, #tpu.memory_space<vmem>>, vector<16x128xf32>
    %c0_2 = arith.constant 0 : index
    %c0_3 = arith.constant 0 : index
    %c0_4 = arith.constant 0 : index
    %4 = vector.load %arg4[%c0_2, %c0_3, %c0_4] : memref<1x128x128xf32, #tpu.memory_space<vmem>>, vector<1x128x128xf32>
    %5 = vector.shape_cast %4 : vector<1x128x128xf32> to vector<128x128xf32>
    %cst = arith.constant dense<0.000000e+00> : vector<16x128xf32>
    %6 = tpu.matmul %3, %5, %cst {dimension_numbers = #tpu.dot_dimension_numbers<[1], [1], [0], [0], [0, 0, 1, 0], [], []>} : vector<16x128xf32>, vector<128x128xf32>, vector<16x128xf32> -> vector<16x128xf32>
    %c0_5 = arith.constant 0 : index
    %c0_6 = arith.constant 0 : index
    %c0_7 = arith.constant 0 : index
    %7 = vector.load %arg6[%c0_5, %c0_6, %c0_7] : memref<1x16x128xf32, #tpu.memory_space<vmem>>, vector<1x16x128xf32>
    %8 = vector.shape_cast %7 : vector<1x16x128xf32> to vector<16x128xf32>
    %9 = vector.shape_cast %6 : vector<16x128xf32> to vector<1x16x128xf32>
    tpu.vector_store %arg6[%c0_5, %c0_6, %c0_7], %9 {strides = array<i32>} : memref<1x16x128xf32, #tpu.memory_space<vmem>>, vector<1x16x128xf32>,
    return
  }
  func.func @transform_0(%arg0: i32, %arg1: i32, %arg2: i32) -> (i32, i32, i32) {
    %c0_i32 = arith.constant 0 : i32
    %c0_i32_0 = arith.constant 0 : i32
    return %arg0, %arg1, %c0_i32 : i32, i32, i32
  }
  func.func @transform_1(%arg0: i32, %arg1: i32, %arg2: i32) -> (i32, i32, i32) {
    %c0_i32 = arith.constant 0 : i32
    %c0_i32_0 = arith.constant 0 : i32
    return %arg0, %arg2, %c0_i32 : i32, i32, i32
  }
  func.func @transform_2(%arg0: i32, %arg1: i32, %arg2: i32) -> (i32, i32) {
    %c0_i32 = arith.constant 0 : i32
    %c0_i32_0 = arith.constant 0 : i32
    %c0_i32_1 = arith.constant 0 : i32
    return %c0_i32, %c0_i32_0 : i32, i32
  }
  func.func @transform_3(%arg0: i32, %arg1: i32, %arg2: i32) -> (i32, i32, i32) {
    %c0_i32 = arith.constant 0 : i32
    return %arg0, %arg1, %arg2 : i32, i32, i32
  }
}

</mosaic_0001>

<bundles_post_ra>
// kernel: trilinear_similarity.1
= control target key start
LH: loop header
LB: loop body
LE: loop exit
PB: predicated region body
PF: predicated region fallthrough
CT: control target
= control target key end

     0   :  { %s763_s12 = smov 0   ;;  %s765_s13 = smov 0   ;;  %s877_s0 = inlined_call_operand.vmem [shape: f32[2,16,128], index: 0, kind: input, shape index: {}]   ;;  %s878_s1 = inlined_call_operand.vmem [shape: f32[2,128,128], index: 1, kind: input, shape index: {}]   ;;  %s879_s2 = inlined_call_operand.vmem [shape: f32[128,128], index: 2, kind: input, shape index: {}]   ;;  %s880_s3 = inlined_call_operand.vmem [shape: f32[2,16,128], index: 3, kind: output, shape index: {}]  }
   0x1   :  { %s767_s14 = smov 0  }
   0x2 LB: > { %s32_s15 = sadd.s32 1, %s737_s13  ;;  %p577_p0 = scmp.ge.s32.totalorder %s741_s14, 1  ;;  %s741_s14 = sphi %s767_s14, %s13_s14   ;;  %s737_s13 = sphi %s765_s13, %s882_s13   ;;  %s733_s12 = sphi %s763_s12, %s881_s12  }
   0x3   : > { %p34_p1 = scmp.ge.s32.totalorder %s32_s15, 2  ;;  %p184_p2 = scmp.lt.s32.totalorder %s741_s14, 3 }
   0x5   : > { %s884_s15 = smov (%p34_p1, %s32_s15), 0  ;;  %p185_p3 = pnand %p577_p0, %p184_p2 }
   0x6   : > { %p229_p4 = scmp.lt.s32.totalorder (!%p185_p3), %s733_s12, 1 }
   0x7   : > { %188 = sbr.rel (%p185_p3) target bundleno = 437 (0x1b5), region = 32 }
   0xc   : > { %v282_v0 = vld [vmem:[%s879_s2 + $0x78] sm:$0xff]  ;;  %v281_v1 = vld [vmem:[%s879_s2 + $0x70] sm:$0xff]  ;;  %v280_v2 = vld [vmem:[%s879_s2 + $0x68] sm:$0xff]  ;;  %s886_s12 = smov (!%p229_p4, %s733_s12), 1 }
   0xd   : > { %625 = vmatprep.subr.mxu0 %v282_v0  ;;  %v279_v3 = vld [vmem:[%s879_s2 + $0x60] sm:$0xff]  ;;  %s586_s24 = sshll.u32 %s886_s12, 4  ;;  %s587_s25 = sshll.u32 %s886_s12, 7  ;;  %v278_v4 = vld [vmem:[%s879_s2 + $0x58] sm:$0xff]  ;;  %v277_v8 = vld [vmem:[%s879_s2 + $0x50] sm:$0xff] }
   0xe   : > { %626 = vmatpush3.msra.mxu0 %v282_v0  ;;  %s802_s28 = scalar_lea.vmem %s877_s0, %s586_s24  ;;  %s807_s4 = scalar_lea.vmem %s878_s1, %s587_s25  ;;  %v276_v9 = vld [vmem:[%s879_s2 + $0x48] sm:$0xff]  ;;  %v275_v11 = vld [vmem:[%s879_s2 + $0x40] sm:$0xff]  ;;  %v274_v12 = vld [vmem:[%s879_s2 + $0x38] sm:$0xff] }
   0xf   : > { %627 = vmatprep.subr.mxu0 %v281_v1  ;;  %v265_v5 = vld [vmem:[%s802_s28] sm:$0xff]  ;;  %v377_v6 = vld [vmem:[%s807_s4 + $0x78] sm:$0xff]  ;;  %v376_v7 = vld [vmem:[%s807_s4 + $0x70] sm:$0xff]  ;;  %s259_s10 = scalar_lea.vmem %s880_s3, %s586_s24 }
  0x10   : > { %628 = vmatpush3.msra.mxu0 %v281_v1  ;;  %657 = vmatprep.mubr.f32.mxu0 %v265_v5  ;;  %v375_v10 = vld [vmem:[%s807_s4 + $0x68] sm:$0xff]  ;;  %v374_v13 = vld [vmem:[%s807_s4 + $0x60] sm:$0xff]  ;;  %v273_v14 = vld [vmem:[%s879_s2 + $0x30] sm:$0xff] }
  0x11   : > { %629 = vmatprep.subr.mxu0 %v280_v2  ;;  %660 = vmatprep.subr.mxu1 %v377_v6  ;;  %v272_v15 = vld [vmem:[%s879_s2 + $0x28] sm:$0xff]  ;;  %v373_v16 = vld [vmem:[%s807_s4 + $0x58] sm:$0xff]  ;;  %v271_v17 = vld [vmem:[%s879_s2 + $0x20] sm:$0xff] }
  0x12   : > { %630 = vmatpush3.msra.mxu0 %v280_v2  ;;  %661 = vmatpush3.xpose.msra.mxu1 %v377_v6  ;;  %v270_v18 = vld [vmem:[%s879_s2 + $0x18] sm:$0xff]  ;;  %v372_v19 = vld [vmem:[%s807_s4 + $0x50] sm:$0xff]  ;;  %v268_v21 = vld [vmem:[%s879_s2 + $0x8] sm:$0xff] }
  0x13   : > { %631 = vmatprep.subr.mxu0 %v279_v3  ;;  %662 = vmatprep.subr.mxu1 %v376_v7  ;;  %v269_v20 = vld [vmem:[%s879_s2 + $0x10] sm:$0xff]  ;;  %v371_v22 = vld [vmem:[%s807_s4 + $0x48] sm:$0xff]  ;;  %v267_v23 = vld [vmem:[%s879_s2] sm:$0xff] }
  0x14   : > { %632 = vmatpush3.msra.mxu0 %v279_v3  ;;  %v266_v24 = vld [vmem:[%s802_s28 + $0x8] sm:$0xff]  ;;  %v370_v25 = vld [vmem:[%s807_s4 + $0x40] sm:$0xff]  ;;  %v369_v26 = vld [vmem:[%s807_s4 + $0x38] sm:$0xff] }
  0x15   : > { %633 = vmatprep.subr.mxu0 %v278_v4  ;;  %v368_v27 = vld [vmem:[%s807_s4 + $0x30] sm:$0xff]  ;;  %v367_v28 = vld [vmem:[%s807_s4 + $0x28] sm:$0xff]  ;;  %v366_v29 = vld [vmem:[%s807_s4 + $0x20] sm:$0xff] }
  0x16   : > { %634 = vmatpush3.msra.mxu0 %v278_v4  ;;  %663 = vmatpush3.xpose.msra.mxu1 %v376_v7  ;;  %v365_v30 = vld [vmem:[%s807_s4 + $0x18] sm:$0xff]  ;;  %v364_v31 = vld [vmem:[%s807_s4 + $0x10] sm:$0xff]  ;;  %v363_v32 = vld [vmem:[%s807_s4 + $0x8] sm:$0xff] }
  0x17   : > { %635 = vmatprep.subr.mxu0 %v277_v8  ;;  %664 = vmatprep.subr.mxu1 %v375_v10  ;;  %v362_v33 = vld [vmem:[%s807_s4] sm:$0xff] }
  0x18   : > { %636 = vmatpush3.msra.mxu0 %v277_v8 }
  0x19   : > { %637 = vmatprep.subr.mxu0 %v276_v9 }
  0x1a   : > { %638 = vmatpush3.msra.mxu0 %v276_v9  ;;  %665 = vmatpush3.xpose.msra.mxu1 %v375_v10 }
  0x1b   : > { %639 = vmatprep.subr.mxu0 %v275_v11  ;;  %666 = vmatprep.subr.mxu1 %v374_v13 }
  0x1c   : > { %640 = vmatpush3.msra.mxu0 %v275_v11 }
  0x1d   : > { %641 = vmatprep.subr.mxu0 %v274_v12 }
  0x1e   : > { %642 = vmatpush3.msra.mxu0 %v274_v12  ;;  %667 = vmatpush3.xpose.msra.mxu1 %v374_v13 }
  0x1f   : > { %643 = vmatprep.subr.mxu0 %v273_v14  ;;  %668 = vmatprep.subr.mxu1 %v373_v16 }
  0x20   : > { %644 = vmatpush3.msra.mxu0 %v273_v14 }
  0x21   : > { %645 = vmatprep.subr.mxu0 %v272_v15 }
  0x22   : > { %646 = vmatpush3.msra.mxu0 %v272_v15  ;;  %669 = vmatpush3.xpose.msra.mxu1 %v373_v16 }
  0x23   : > { %647 = vmatprep.subr.mxu0 %v271_v17  ;;  %670 = vmatprep.subr.mxu1 %v372_v19 }
  0x24   : > { %648 = vmatpush3.msra.mxu0 %v271_v17 }
  0x25   : > { %649 = vmatprep.subr.mxu0 %v270_v18 }
  0x26   : > { %650 = vmatpush3.msra.mxu0 %v270_v18  ;;  %671 = vmatpush3.xpose.msra.mxu1 %v372_v19 }
  0x27   : > { %651 = vmatprep.subr.mxu0 %v269_v20  ;;  %672 = vmatprep.subr.mxu1 %v371_v22 }
  0x28   : > { %652 = vmatpush3.msra.mxu0 %v269_v20 }
  0x29   : > { %653 = vmatprep.subr.mxu0 %v268_v21 }
  0x2a   : > { %654 = vmatpush3.msra.mxu0 %v268_v21  ;;  %673 = vmatpush3.xpose.msra.mxu1 %v371_v22 }
  0x2b   : > { %655 = vmatprep.subr.mxu0 %v267_v23  ;;  %674 = vmatprep.subr.mxu1 %v370_v25 }
  0x2c   : > { %656 = vmatpush3.msra.mxu0 %v267_v23 }
  0x2d   : > { %658 = vmatmul.mubr.f32.vlgmr.msra.gmra.mxu0 %v266_v24 }
  0x2e   : > { %675 = vmatpush3.xpose.msra.mxu1 %v370_v25 }
  0x2f   : > { %676 = vmatprep.subr.mxu1 %v369_v26 }
  0x32   : > { %677 = vmatpush3.xpose.msra.mxu1 %v369_v26 }
  0x33   : > { %678 = vmatprep.subr.mxu1 %v368_v27 }
  0x36   : > { %679 = vmatpush3.xpose.msra.mxu1 %v368_v27 }
  0x37   : > { %680 = vmatprep.subr.mxu1 %v367_v28 }
  0x3a   : > { %681 = vmatpush3.xpose.msra.mxu1 %v367_v28 }
  0x3b   : > { %682 = vmatprep.subr.mxu1 %v366_v29 }
  0x3e   : > { %683 = vmatpush3.xpose.msra.mxu1 %v366_v29 }
  0x3f   : > { %684 = vmatprep.subr.mxu1 %v365_v30 }
  0x42   : > { %685 = vmatpush3.xpose.msra.mxu1 %v365_v30 }
  0x43   : > { %686 = vmatprep.subr.mxu1 %v364_v31 }
  0x46   : > { %687 = vmatpush3.xpose.msra.mxu1 %v364_v31 }
  0x47   : > { %688 = vmatprep.subr.mxu1 %v363_v32 }
  0x4a   : > { %689 = vmatpush3.xpose.msra.mxu1 %v363_v32 }
  0x4b   : > { %690 = vmatprep.subr.mxu1 %v362_v33 }
  0x4e   : > { %691 = vmatpush3.xpose.msra.mxu1 %v362_v33 }
  0xed   : > { %v659_v34 = vpop.f32.mrf.mxu0 }
  0xef   : > { %v349_v35 = vpop.f32.mrf.mxu0 }
  0xf0   : > { %692 = vmatprep.mubr.f32.mxu1 %v349_v35 }
  0xf1   : > { %693 = vmatmul.mubr.f32.vlgmr.msra.gmra.mxu1 %v659_v34 }
 0x1b1   : > { %v694_v36 = vpop.f32.mrf.mxu1 }
 0x1b2   : > { %454 = vst [vmem:[%s259_s10 + $0x8] sm:$0xff] %v694_v36 }
 0x1b3   : > { %v444_v37 = vpop.f32.mrf.mxu1 }
 0x1b4   : > { %453 = vst [vmem:[%s259_s10] sm:$0xff] %v444_v37 }
 0x1b5 PF: > { %s13_s14 = sadd.s32 1, %s741_s14   ;;  %s881_s12 = smov %s737_s13 }
 0x1b6   : > { %p10_p5 = scmp.ge.s32.totalorder %s13_s14, 4   ;;  %s882_s13 = smov %s884_s15 }
 0x1b8   :  { %12 = sbr.rel (!%p10_p5) target bundleno = 2 (0x2), region = 69 }

</bundles_post_ra>
